<compile_context>
chip_gen: v7x
topology: tpu7x:2x2x1
jax: 0.10.0
libtpu: 0.0.40
codegen_flags: <defaults>
</compile_context>

<pallas_src>
import functools
import math
from types import SimpleNamespace

import jax
import jax.numpy as jnp
from jax.experimental import pallas as pl
from jax.experimental.pallas import tpu as pltpu


_VMEM_LIMIT = 48 * 1024 * 1024  # fits v7x (64 MiB/TC) as well as v5e/v6e


# ---------------------------------------------------------------------------
# Pallas kernels: one big (TM, K) @ (K, Cout) matmul per tile, fused with
# bias add and optional LeakyReLU.  Optional fused trailing 1x1 conv
# (used for conv9_2 -> conv10).
# ---------------------------------------------------------------------------
def _conv_mm_kernel(p_ref, w_ref, b_ref, o_ref, *, negative_slope):
    # p_ref: (1, TM, K) bf16   w_ref: (K, Cout) bf16   b_ref: (1, Cout) f32
    acc = jnp.dot(p_ref[0], w_ref[...], preferred_element_type=jnp.float32)
    acc = acc + b_ref[...]
    if negative_slope is not None:  # fused LeakyReLU
        acc = jnp.where(acc >= 0.0, acc, acc * negative_slope)
    o_ref[0] = acc


def _conv_mm_fused1x1_kernel(p_ref, w_ref, b_ref, w2_ref, b2_ref, o_ref, *,
                             negative_slope):
    # conv (KxK) + LeakyReLU + fused 1x1 conv epilogue.
    acc = jnp.dot(p_ref[0], w_ref[...], preferred_element_type=jnp.float32)
    acc = acc + b_ref[...]
    acc = jnp.where(acc >= 0.0, acc, acc * negative_slope)
    acc2 = jnp.dot(acc.astype(w2_ref.dtype), w2_ref[...],
                   preferred_element_type=jnp.float32)
    o_ref[0] = acc2 + b2_ref[...]


def _im2col(x_bf16, KH, KW, pad):
    """(N,H,W,Cin) -> (N, Ho*Wo, KH*KW*Cin) patches, feature order (kh,kw,cin)."""
    # TODO(synk): replace this HBM-materialized im2col with halo-tiled rows +
    # manual DMA + in-kernel tap formation to cut the ~KH*KW x activation traffic.
    N, H, W, Cin = x_bf16.shape
    xp = jnp.pad(x_bf16, ((0, 0), (pad, pad), (pad, pad), (0, 0)))
    Ho = H + 2 * pad - KH + 1
    Wo = W + 2 * pad - KW + 1
    taps = []
    for dy in range(KH):
        for dx in range(KW):
            taps.append(xp[:, dy:dy + Ho, dx:dx + Wo, :])
    patches = jnp.concatenate(taps, axis=-1)           # (N, Ho, Wo, T*Cin)
    return patches.reshape(N, Ho * Wo, KH * KW * Cin), Ho, Wo


def _tile_m(M):
    if M >= 512:
        return 512
    return max(8, ((M + 7) // 8) * 8)


def conv2d(x, w, b, *, pad, negative_slope=None, w_1x1=None, b_1x1=None):
    """x: (N,H,W,Cin) f32, w: (KH,KW,Cin,Cout), b: (Cout,) -> (N,Ho,Wo,Cfin).

    If w_1x1/b_1x1 are given, a 1x1 conv (Cout -> Cfin) is fused after the
    LeakyReLU epilogue (used for conv9_2 -> conv10).
    """
    N, H, W, Cin = x.shape
    KH, KW, _, Cout = w.shape
    K = KH * KW * Cin

    patches, Ho, Wo = _im2col(x.astype(jnp.bfloat16), KH, KW, pad)
    M = Ho * Wo
    TM = _tile_m(M)
    Mp = ((M + TM - 1) // TM) * TM
    if Mp != M:
        patches = jnp.pad(patches, ((0, 0), (0, Mp - M), (0, 0)))

    w_flat = w.reshape(K, Cout).astype(jnp.bfloat16)
    b_row = b.reshape(1, Cout).astype(jnp.float32)

    in_specs = [
        pl.BlockSpec((1, TM, K), lambda n, m: (n, m, 0)),
        pl.BlockSpec((K, Cout), lambda n, m: (0, 0)),   # weights stay resident
        pl.BlockSpec((1, Cout), lambda n, m: (0, 0)),
    ]
    args = [patches, w_flat, b_row]

    if w_1x1 is None:
        Cfin = Cout
        kernel = functools.partial(_conv_mm_kernel,
                                   negative_slope=negative_slope)
    else:
        Cfin = w_1x1.shape[-1]
        w2 = w_1x1.reshape(Cout, Cfin).astype(jnp.bfloat16)
        b2_row = b_1x1.reshape(1, Cfin).astype(jnp.float32)
        in_specs += [
            pl.BlockSpec((Cout, Cfin), lambda n, m: (0, 0)),
            pl.BlockSpec((1, Cfin), lambda n, m: (0, 0)),
        ]
        args += [w2, b2_row]
        kernel = functools.partial(_conv_mm_fused1x1_kernel,
                                   negative_slope=negative_slope)

    out = pl.pallas_call(
        kernel,
        out_shape=jax.ShapeDtypeStruct((N, Mp, Cfin), jnp.float32),
        grid=(N, Mp // TM),
        in_specs=in_specs,
        out_specs=pl.BlockSpec((1, TM, Cfin), lambda n, m: (n, m, 0)),
        compiler_params=pltpu.CompilerParams(
            dimension_semantics=("parallel", "parallel"),
            vmem_limit_bytes=_VMEM_LIMIT),
    )(*args)
    return out[:, :M, :].reshape(N, Ho, Wo, Cfin)


# ---------------------------------------------------------------------------
# Glue ops (pooling, batch-norm statistics, bilinear upsample, padding).
# These are memory-bound elementwise/reduction ops left to XLA.
# ---------------------------------------------------------------------------
def maxpool2(x):
    N, H, W, C = x.shape
    return jnp.max(x.reshape(N, H // 2, 2, W // 2, 2, C), axis=(2, 4))


def avgpool2(x):
    N, H, W, C = x.shape
    return jnp.mean(x.reshape(N, H // 2, 2, W // 2, 2, C), axis=(2, 4))


def batchnorm(x, eps=1e-5):
    # Training-mode BatchNorm2d, gamma=1, beta=0, biased variance (PyTorch default).
    # TODO(synk): fold the normalization of *_1 layers into the following conv's
    # weights/bias to save an HBM round trip (stats still need one read).
    mean = jnp.mean(x, axis=(0, 1, 2), keepdims=True)
    var = jnp.mean((x - mean) ** 2, axis=(0, 1, 2), keepdims=True)
    return (x - mean) / jnp.sqrt(var + eps)


def upsample2_bilinear(x):
    N, H, W, C = x.shape
    return jax.image.resize(x, (N, 2 * H, 2 * W, C), method="bilinear")


def pad_tensor(x, divide=16):
    N, H, W, C = x.shape
    if H % divide == 0 and W % divide == 0:
        return x, (0, 0, 0, 0)
    wres, hres = W % divide, H % divide
    wpad = (divide - wres) if wres else 0
    hpad = (divide - hres) if hres else 0
    pad_l = wpad // 2
    pad_r = wpad - pad_l
    pad_t = hpad // 2
    pad_b = hpad - pad_t
    x = jnp.pad(x, ((0, 0), (pad_t, pad_b), (pad_l, pad_r), (0, 0)),
                mode="reflect")
    return x, (pad_l, pad_r, pad_t, pad_b)


def pad_tensor_back(x, pads):
    pad_l, pad_r, pad_t, pad_b = pads
    N, H, W, C = x.shape
    return x[:, pad_t:H - pad_b, pad_l:W - pad_r, :]


# ---------------------------------------------------------------------------
# Parameters (deterministic init matching the Conv2d shapes in __init__).
# ---------------------------------------------------------------------------
_CONV_SPECS = {
    "conv1_1": (3, 3, 4, 32),   "conv1_2": (3, 3, 32, 32),
    "conv2_1": (3, 3, 32, 64),  "conv2_2": (3, 3, 64, 64),
    "conv3_1": (3, 3, 64, 128), "conv3_2": (3, 3, 128, 128),
    "conv4_1": (3, 3, 128, 256), "conv4_2": (3, 3, 256, 256),
    "conv5_1": (3, 3, 256, 512), "conv5_2": (3, 3, 512, 512),
    "deconv5": (3, 3, 512, 256),
    "conv6_1": (3, 3, 512, 256), "conv6_2": (3, 3, 256, 256),
    "deconv6": (3, 3, 256, 128),
    "conv7_1": (3, 3, 256, 128), "conv7_2": (3, 3, 128, 128),
    "deconv7": (3, 3, 128, 64),
    "conv8_1": (3, 3, 128, 64), "conv8_2": (3, 3, 64, 64),
    "deconv8": (3, 3, 64, 32),
    "conv9_1": (3, 3, 64, 32), "conv9_2": (3, 3, 32, 32),
    "conv10": (1, 1, 32, 3),
}


def init_params(key):
    params = {}
    for i, name in enumerate(sorted(_CONV_SPECS)):
        shp = _CONV_SPECS[name]
        kw, kb = jax.random.split(jax.random.fold_in(key, i))
        fan_in = shp[0] * shp[1] * shp[2]
        bound = 1.0 / math.sqrt(fan_in)
        params[name] = (
            jax.random.uniform(kw, shp, jnp.float32, -bound, bound),
            jax.random.uniform(kb, (shp[3],), jnp.float32, -bound, bound),
        )
    return params


# ---------------------------------------------------------------------------
# Forward pass (mirrors Unet_resize_conv.forward).
# ---------------------------------------------------------------------------
def unet_forward(params, input_nchw, gray_nchw, opt):
    def c(name, x, act=True, pad=1):
        w, b = params[name]
        return conv2d(x, w, b, pad=pad,
                      negative_slope=0.2 if act else None)

    pool = avgpool2 if opt.use_avgpool == 1 else maxpool2

    # NCHW -> NHWC
    inp = jnp.transpose(input_nchw, (0, 2, 3, 1)).astype(jnp.float32)
    gray = jnp.transpose(gray_nchw, (0, 2, 3, 1)).astype(jnp.float32)

    flag = 0
    if inp.shape[2] > 2200:  # width check (static)
        inp = avgpool2(inp)
        gray = avgpool2(gray)
        flag = 1

    inp, pads = pad_tensor(inp)
    gray, pads = pad_tensor(gray)

    gray_2 = maxpool2(gray)      # downsample_1..4 are always MaxPool2d(2)
    gray_3 = maxpool2(gray_2)
    gray_4 = maxpool2(gray_3)
    gray_5 = maxpool2(gray_4)

    x = batchnorm(c("conv1_1", jnp.concatenate([inp, gray], axis=-1)))
    conv1 = batchnorm(c("conv1_2", x))
    x = pool(conv1)
    x = batchnorm(c("conv2_1", x))
    conv2 = batchnorm(c("conv2_2", x))
    x = pool(conv2)
    x = batchnorm(c("conv3_1", x))
    conv3 = batchnorm(c("conv3_2", x))
    x = pool(conv3)
    x = batchnorm(c("conv4_1", x))
    conv4 = batchnorm(c("conv4_2", x))
    x = pool(conv4)
    x = batchnorm(c("conv5_1", x))
    x = x * gray_5 if opt.self_attention else x
    conv5 = batchnorm(c("conv5_2", x))
    conv5 = upsample2_bilinear(conv5)
    conv4 = conv4 * gray_4 if opt.self_attention else conv4
    up6 = jnp.concatenate([c("deconv5", conv5, act=False), conv4], axis=-1)
    x = batchnorm(c("conv6_1", up6))
    conv6 = batchnorm(c("conv6_2", x))
    conv6 = upsample2_bilinear(conv6)
    conv3 = conv3 * gray_3 if opt.self_attention else conv3
    up7 = jnp.concatenate([c("deconv6", conv6, act=False), conv3], axis=-1)
    x = batchnorm(c("conv7_1", up7))
    conv7 = batchnorm(c("conv7_2", x))
    conv7 = upsample2_bilinear(conv7)
    conv2 = conv2 * gray_2 if opt.self_attention else conv2
    up8 = jnp.concatenate([c("deconv7", conv7, act=False), conv2], axis=-1)
    x = batchnorm(c("conv8_1", up8))
    conv8 = batchnorm(c("conv8_2", x))
    conv8 = upsample2_bilinear(conv8)
    conv1 = conv1 * gray if opt.self_attention else conv1
    up9 = jnp.concatenate([c("deconv8", conv8, act=False), conv1], axis=-1)
    x = batchnorm(c("conv9_1", up9))
    # conv9_2 (LeakyReLU, no BN) with conv10 (1x1) fused into its epilogue.
    w92, b92 = params["conv9_2"]
    w10, b10 = params["conv10"]
    latent = conv2d(x, w92, b92, pad=1, negative_slope=0.2,
                    w_1x1=w10, b_1x1=b10)

    if opt.times_residual:
        latent = latent * gray
    if opt.tanh:
        latent = jnp.tanh(latent)

    if opt.skip:
        if opt.linear_add:
            if opt.latent_threshold:
                latent = jax.nn.relu(latent)
            elif opt.latent_norm:
                latent = (latent - jnp.min(latent)) / (jnp.max(latent) - jnp.min(latent))
            inp_n = (inp - jnp.min(inp)) / (jnp.max(inp) - jnp.min(inp))
            output = latent + inp_n * opt.skip
            output = output * 2.0 - 1.0
        else:
            if opt.latent_threshold:
                latent = jax.nn.relu(latent)
            elif opt.latent_norm:
                latent = (latent - jnp.min(latent)) / (jnp.max(latent) - jnp.min(latent))
            output = latent + inp * opt.skip
    else:
        output = latent

    if opt.linear:
        output = output / jnp.max(jnp.abs(output))

    output = pad_tensor_back(output, pads)
    latent = pad_tensor_back(latent, pads)
    gray = pad_tensor_back(gray, pads)
    if flag == 1:
        output = upsample2_bilinear(output)
        gray = upsample2_bilinear(gray)

    # NHWC -> NCHW for the caller
    output = jnp.transpose(output, (0, 3, 1, 2))
    latent = jnp.transpose(latent, (0, 3, 1, 2))
    if opt.skip:
        return output, latent
    return output


if __name__ == "__main__":
    key = jax.random.PRNGKey(0)
    kx, kg, kp = jax.random.split(key, 3)
    N, H, W = 2, 16, 16
    # PyTorch-style NCHW inputs: RGB image (3 ch) + attention/gray map (1 ch).
    x_nchw = jax.random.uniform(kx, (N, 3, H, W), jnp.float32)
    gray_nchw = jax.random.uniform(kg, (N, 1, H, W), jnp.float32)
    params = init_params(kp)

    opt = SimpleNamespace(
        syn_norm=False, use_avgpool=0, self_attention=True,
        times_residual=True, tanh=False, skip=1.0, linear_add=False,
        latent_threshold=False, latent_norm=False, linear=False,
    )

    output, latent = unet_forward(params, x_nchw, gray_nchw, opt)
    output = jax.block_until_ready(output)
    latent = jax.block_until_ready(latent)
    assert output.shape == (N, 3, H, W), output.shape
    assert latent.shape == (N, 3, H, W), latent.shape
    assert jnp.all(jnp.isfinite(output)) and jnp.all(jnp.isfinite(latent))
    print("KERNEL_OK")
</pallas_src>

<mosaic_0001>
module attributes {stable_mosaic.version = 11 : i64} {
  func.func @_conv_mm_kernel(%arg0: i32, %arg1: i32, %arg2: memref<1x256x36xbf16, #tpu.memory_space<vmem>>, %arg3: memref<36x32xbf16, #tpu.memory_space<vmem>>, %arg4: memref<1x32xf32, #tpu.memory_space<vmem>>, %arg5: memref<1x256x32xf32, #tpu.memory_space<vmem>>) attributes {dimension_semantics = [#tpu.dimension_semantics<parallel>, #tpu.dimension_semantics<parallel>], iteration_bounds = array<i64: 2, 1>, scalar_prefetch = 0 : i64, scratch_operands = 0 : i64, tpu.core_type = #tpu.core_type<tc>, window_params = [{transform_indices = @transform_0, window_bounds = array<i64: 1, 256, 36>}, {pipeline_mode = #tpu.pipeline_mode<synchronous>, transform_indices = @transform_1, window_bounds = array<i64: 36, 32>}, {pipeline_mode = #tpu.pipeline_mode<synchronous>, transform_indices = @transform_2, window_bounds = array<i64: 1, 32>}, {transform_indices = @transform_3, window_bounds = array<i64: 1, 256, 32>}]} {
    %c0 = arith.constant 0 : index
    %c0_0 = arith.constant 0 : index
    %c0_1 = arith.constant 0 : index
    %0 = vector.load %arg2[%c0, %c0_0, %c0_1] : memref<1x256x36xbf16, #tpu.memory_space<vmem>>, vector<1x256x36xbf16>
    %1 = vector.shape_cast %0 : vector<1x256x36xbf16> to vector<256x36xbf16>
    %c0_2 = arith.constant 0 : index
    %c0_3 = arith.constant 0 : index
    %2 = vector.load %arg3[%c0_2, %c0_3] : memref<36x32xbf16, #tpu.memory_space<vmem>>, vector<36x32xbf16>
    %cst = arith.constant dense<0.000000e+00> : vector<256x32xf32>
    %3 = tpu.matmul %1, %2, %cst {dimension_numbers = #tpu.dot_dimension_numbers<[1], [0], [0], [1], [0, 0, 1, 1], [], []>} : vector<256x36xbf16>, vector<36x32xbf16>, vector<256x32xf32> -> vector<256x32xf32>
    %c0_4 = arith.constant 0 : index
    %c0_5 = arith.constant 0 : index
    %4 = vector.load %arg4[%c0_4, %c0_5] : memref<1x32xf32, #tpu.memory_space<vmem>>, vector<1x32xf32>
    %5 = vector.broadcast %4 : vector<1x32xf32> to vector<256x32xf32>
    %6 = arith.addf %3, %5 : vector<256x32xf32>
    %cst_6 = arith.constant 0.000000e+00 : f32
    %7 = vector.broadcast %cst_6 : f32 to vector<256x32xf32>
    %8 = arith.cmpf oge, %6, %7 : vector<256x32xf32>
    %cst_7 = arith.constant 2.000000e-01 : f32
    %9 = vector.broadcast %cst_7 : f32 to vector<256x32xf32>
    %10 = arith.mulf %6, %9 : vector<256x32xf32>
    %11 = arith.select %8, %6, %10 : vector<256x32xi1>, vector<256x32xf32>
    %c0_8 = arith.constant 0 : index
    %c0_9 = arith.constant 0 : index
    %c0_10 = arith.constant 0 : index
    %12 = vector.load %arg5[%c0_8, %c0_9, %c0_10] : memref<1x256x32xf32, #tpu.memory_space<vmem>>, vector<1x256x32xf32>
    %13 = vector.shape_cast %12 : vector<1x256x32xf32> to vector<256x32xf32>
    %14 = vector.shape_cast %11 : vector<256x32xf32> to vector<1x256x32xf32>
    tpu.vector_store %arg5[%c0_8, %c0_9, %c0_10], %14 {strides = array<i32>} : memref<1x256x32xf32, #tpu.memory_space<vmem>>, vector<1x256x32xf32>,
    return
  }
  func.func @transform_0(%arg0: i32, %arg1: i32) -> (i32, i32, i32) {
    %c0_i32 = arith.constant 0 : i32
    %c0_i32_0 = arith.constant 0 : i32
    return %arg0, %arg1, %c0_i32 : i32, i32, i32
  }
  func.func @transform_1(%arg0: i32, %arg1: i32) -> (i32, i32) {
    %c0_i32 = arith.constant 0 : i32
    %c0_i32_0 = arith.constant 0 : i32
    %c0_i32_1 = arith.constant 0 : i32
    return %c0_i32, %c0_i32_0 : i32, i32
  }
  func.func @transform_2(%arg0: i32, %arg1: i32) -> (i32, i32) {
    %c0_i32 = arith.constant 0 : i32
    %c0_i32_0 = arith.constant 0 : i32
    %c0_i32_1 = arith.constant 0 : i32
    return %c0_i32, %c0_i32_0 : i32, i32
  }
  func.func @transform_3(%arg0: i32, %arg1: i32) -> (i32, i32, i32) {
    %c0_i32 = arith.constant 0 : i32
    %c0_i32_0 = arith.constant 0 : i32
    return %arg0, %arg1, %c0_i32 : i32, i32, i32
  }
}

</mosaic_0001>

<bundles_post_ra>
// kernel: tpu_custom_call.1
= control target key start
LH: loop header
LB: loop body
LE: loop exit
PB: predicated region body
PF: predicated region fallthrough
CT: control target
= control target key end

     0   :  { %s981_s12 = smov 0   ;;  %s983_s13 = smov 0   ;;  %s1164_s0 = inlined_call_operand.vmem [shape: bf16[2,256,36], index: 0, kind: input, shape index: {}]   ;;  %s1165_s1 = inlined_call_operand.vmem [shape: bf16[36,32], index: 1, kind: input, shape index: {}]   ;;  %s1166_s2 = inlined_call_operand.vmem [shape: f32[1,32], index: 2, kind: input, shape index: {}]   ;;  %s1167_s3 = inlined_call_operand.vmem [shape: f32[2,256,32], index: 3, kind: output, shape index: {}]  }
   0x1   :  { %s985_s14 = smov 0  }
   0x2 LB: > { %s25_s15 = sadd.s32 1, %s955_s13  ;;  %p784_p0 = scmp.ge.s32.totalorder %s959_s14, 1  ;;  %s959_s14 = sphi %s985_s14, %s13_s14   ;;  %s955_s13 = sphi %s983_s13, %s1169_s13   ;;  %s951_s12 = sphi %s981_s12, %s1168_s12  }
   0x3   : > { %p27_p1 = scmp.ge.s32.totalorder %s25_s15, 2  ;;  %p158_p2 = scmp.lt.s32.totalorder %s959_s14, 3 }
   0x5   : > { %s1171_s15 = smov (%p27_p1, %s25_s15), 0  ;;  %p159_p3 = pnand %p784_p0, %p158_p2 }
   0x6   : > { %v918_v0 = vld [vmem:[%s1165_s1] sm:$0xff] (!%p159_p3)   ;;  %v919_v1 = vld [vmem:[%s1165_s1 + $0x8] sm:$0xff] (!%p159_p3)   ;;  %p191_p4 = scmp.lt.s32.totalorder (!%p159_p3), %s951_s12, 1  ;;  %v920_v2 = vld [vmem:[%s1165_s1 + $0x10] ss:$0 sps:$4 sm:$0x33] (!%p159_p3)  }
   0x7   : > { %162 = sbr.rel (%p159_p3) target bundleno = 269 (0x10d), region = 32  ;;  %848 = vmatprep.subr.bf16.mxu0 (!%p159_p3), %v918_v0  ;;  %886 = vmatprep.subr.bf16.mxu1 (!%p159_p3), %v918_v0  ;;  %vm399_vm0 = vcmask (!%p159_p3), 1041408   ;;  %vm350_vm1 = vcmask (!%p159_p3), 293888   ;;  %v1051_v20 = vld [vmem:[%s1166_s2] ss:$0 sm:$0xff] (!%p159_p3)  ;;  %vm660_vm2 = vcmask (!%p159_p3), 261120  }
   0x8   : > { %849 = vmatpush3.bf16.msra.mxu0 (!%p159_p3), %v918_v0  ;;  %889 = vmatpush3.bf16.msra.mxu1 (!%p159_p3), %v918_v0  ;;  %v401_v4 = vsel (!%p159_p3), %vm399_vm0, %v920_v2, 0 }
   0x9   : > { %850 = vmatprep.subr.bf16.mxu0 (!%p159_p3), %v919_v1  ;;  %887 = vmatprep.subr.bf16.mxu1 (!%p159_p3), %v919_v1 }
   0xc   : > { %851 = vmatpush3.bf16.msra.mxu0 (!%p159_p3), %v919_v1  ;;  %890 = vmatpush3.bf16.msra.mxu1 (!%p159_p3), %v919_v1 }
   0xd   : > { %892 = vmatprep.subr.msk.bf16.mxu0 (!%p159_p3), %vm399_vm0, %v920_v2  ;;  %893 = vmatprep.subr.msk.bf16.mxu1 (!%p159_p3), %vm399_vm0, %v920_v2 }
   0xe   : > { %s1173_s12 = smov (!%p191_p4, %s951_s12), 1 }
   0xf   : > { %s827_s22 = sshll.u32 %s1173_s12, 7  ;;  %s828_s28 = sshll.u32 %s1173_s12, 8 }
  0x10   : > { %s1014_s25 = scalar_lea.vmem %s1164_s0, %s827_s22  ;;  %853 = vmatpush3.bf16.msra.mxu0 %v401_v4  ;;  %891 = vmatpush3.bf16.msra.mxu1 %v401_v4  ;;  %s1061_s4 = scalar_lea.vmem %s1167_s3, %s828_s28 }
  0x11   : > { %v921_v3 = vld [vmem:[%s1014_s25] sm:$0xff]   ;;  %v923_v6 = vld [vmem:[%s1014_s25 + $0x8] sm:$0xff]   ;;  %v925_v8 = vld [vmem:[%s1014_s25 + $0x10] sm:$0xff]  }
  0x12   : > { %v922_v5 = vld [vmem:[%s1014_s25 + $0x40] sm:$0xff]   ;;  %854 = vmatprep.mubr.msk.bf16.mxu0 %vm350_vm1, %v921_v3  ;;  %v924_v7 = vld [vmem:[%s1014_s25 + $0x48] sm:$0xff]   ;;  %v926_v9 = vld [vmem:[%s1014_s25 + $0x50] sm:$0xff]  }
  0x13   : > { %870 = vmatprep.mubr.msk.bf16.mxu1 %vm350_vm1, %v922_v5  ;;  %855 = vmatmul.mubr.msk.bf16.vlgmr.msra.gmra.mrb[0].mxu0 %vm350_vm1, %v923_v6  ;;  %v927_v10 = vld [vmem:[%s1014_s25 + $0x18] sm:$0xff]   ;;  %v929_v12 = vld [vmem:[%s1014_s25 + $0x20] sm:$0xff]   ;;  %v931_v14 = vld [vmem:[%s1014_s25 + $0x28] sm:$0xff]  }
  0x14   : > { %871 = vmatmul.mubr.msk.bf16.vlgmr.msra.gmra.mrb[0].mxu1 %vm350_vm1, %v924_v7  ;;  %858 = vmatprep.mubr.msk.bf16.mxu0 %vm350_vm1, %v925_v8  ;;  %v928_v11 = vld [vmem:[%s1014_s25 + $0x58] sm:$0xff]   ;;  %v930_v13 = vld [vmem:[%s1014_s25 + $0x60] sm:$0xff]   ;;  %v932_v15 = vld [vmem:[%s1014_s25 + $0x68] sm:$0xff]  }
  0x15   : > { %874 = vmatprep.mubr.msk.bf16.mxu1 %vm350_vm1, %v926_v9  ;;  %v933_v16 = vld [vmem:[%s1014_s25 + $0x30] sm:$0xff]   ;;  %v935_v18 = vld [vmem:[%s1014_s25 + $0x38] sm:$0xff]  }
  0x16   : > { %v934_v17 = vld [vmem:[%s1014_s25 + $0x70] sm:$0xff]   ;;  %v936_v19 = vld [vmem:[%s1014_s25 + $0x78] sm:$0xff]  }
  0x1b   : > { %859 = vmatmul.mubr.msk.bf16.gmra.mrb[4].mxu0 %vm350_vm1, %v927_v10 }
  0x1c   : > { %875 = vmatmul.mubr.msk.bf16.gmra.mrb[4].mxu1 %vm350_vm1, %v928_v11  ;;  %862 = vmatprep.mubr.msk.bf16.mxu0 %vm350_vm1, %v929_v12 }
  0x1d   : > { %878 = vmatprep.mubr.msk.bf16.mxu1 %vm350_vm1, %v930_v13 }
  0x23   : > { %863 = vmatmul.mubr.msk.bf16.gmra.mrb[8].mxu0 %vm350_vm1, %v931_v14 }
  0x24   : > { %879 = vmatmul.mubr.msk.bf16.gmra.mrb[8].mxu1 %vm350_vm1, %v932_v15  ;;  %866 = vmatprep.mubr.msk.bf16.mxu0 %vm350_vm1, %v933_v16 }
  0x25   : > { %882 = vmatprep.mubr.msk.bf16.mxu1 %vm350_vm1, %v934_v17 }
  0x2b   : > { %867 = vmatmul.mubr.msk.bf16.gmra.mrb[12].mxu0 %vm350_vm1, %v935_v18 }
  0x2c   : > { %883 = vmatmul.mubr.msk.bf16.gmra.mrb[12].mxu1 %vm350_vm1, %v936_v19 }
  0xe6   : > { %v856_v21 = vpop.f32.mrb[0].mxu0 }
  0xe7   : > { %v872_v22 = vpop.f32.mrb[0].mxu1  ;;  %v446_v23 = vadd.f32 %v856_v21, %v1051_v20  ;;  %v437_v25 = vpop.f32.mrb[1].mxu0 }
  0xe8   : > { %v510_v24 = vadd.f32 %v872_v22, %v1051_v20  ;;  %v501_v26 = vpop.f32.mrb[1].mxu1  ;;  %v438_v27 = vadd.f32 %v1051_v20, %v437_v25  ;;  %v857_v29 = vpop.f32.mrb[2].mxu0 }
  0xe9   : > { %v502_v28 = vadd.f32 %v1051_v20, %v501_v26  ;;  %v873_v30 = vpop.f32.mrb[2].mxu1  ;;  %vm566_vm3 = vcmp.ge.f32.partialorder %v446_v23, 0.0  ;;  %v598_v31 = vmul.f32 0.2, %v446_v23  ;;  %v449_v37 = vadd.f32 %v857_v29, %v1051_v20  ;;  %v440_v39 = vpop.f32.mrb[3].mxu0 }
  0xea   : > { %vm582_vm4 = vcmp.ge.f32.partialorder %v510_v24, 0.0  ;;  %v614_v32 = vmul.f32 0.2, %v510_v24  ;;  %vm564_vm5 = vcmp.ge.f32.partialorder %v438_v27, 0.0  ;;  %v596_v33 = vmul.f32 0.2, %v438_v27 }
  0xeb   : > { %vm580_vm6 = vcmp.ge.f32.partialorder %v502_v28, 0.0  ;;  %v612_v34 = vmul.f32 0.2, %v502_v28  ;;  %v630_v35 = vsel %vm566_vm3, %v446_v23, %v598_v31  ;;  %v513_v38 = vadd.f32 %v873_v30, %v1051_v20  ;;  %v504_v40 = vpop.f32.mrb[3].mxu1 }
  0xec   : > { %v646_v36 = vsel %vm582_vm4, %v510_v24, %v614_v32  ;;  %663 = vst.msk [vmem:[%s1061_s4 + $0x10] sm:$0xff] %vm660_vm2, %v630_v35  ;;  %v628_v41 = vsel %vm564_vm5, %v438_v27, %v596_v33  ;;  %v441_v43 = vadd.f32 %v1051_v20, %v440_v39  ;;  %v505_v44 = vadd.f32 %v1051_v20, %v504_v40 }
  0xed   : > { %679 = vst.msk [vmem:[%s1061_s4 + $0x90] sm:$0xff] %vm660_vm2, %v646_v36  ;;  %v644_v42 = vsel %vm580_vm6, %v502_v28, %v612_v34  ;;  %661 = vst.msk [vmem:[%s1061_s4] sm:$0xff] %vm660_vm2, %v628_v41  ;;  %vm567_vm7 = vcmp.ge.f32.partialorder %v449_v37, 0.0  ;;  %v599_v45 = vmul.f32 0.2, %v449_v37  ;;  %vm583_vm8 = vcmp.ge.f32.partialorder %v513_v38, 0.0 }
  0xee   : > { %677 = vst.msk [vmem:[%s1061_s4 + $0x80] sm:$0xff] %vm660_vm2, %v644_v42  ;;  %v615_v46 = vmul.f32 0.2, %v513_v38  ;;  %vm565_vm9 = vcmp.ge.f32.partialorder %v441_v43, 0.0  ;;  %v597_v47 = vmul.f32 0.2, %v441_v43 }
  0xef   : > { %vm581_vm10 = vcmp.ge.f32.partialorder %v505_v44, 0.0  ;;  %v613_v48 = vmul.f32 0.2, %v505_v44  ;;  %v631_v49 = vsel %vm567_vm7, %v449_v37, %v599_v45  ;;  %v860_v51 = vpop.f32.mrb[4].mxu0  ;;  %v876_v52 = vpop.f32.mrb[4].mxu1 }
  0xf0   : > { %v647_v50 = vsel %vm583_vm8, %v513_v38, %v615_v46  ;;  %664 = vst.msk [vmem:[%s1061_s4 + $0x18] sm:$0xff] %vm660_vm2, %v631_v49  ;;  %v629_v53 = vsel %vm565_vm9, %v441_v43, %v597_v47  ;;  %v462_v55 = vadd.f32 %v860_v51, %v1051_v20  ;;  %v526_v56 = vadd.f32 %v876_v52, %v1051_v20  ;;  %v453_v57 = vpop.f32.mrb[5].mxu0  ;;  %v517_v58 = vpop.f32.mrb[5].mxu1 }
  0xf1   : > { %680 = vst.msk [vmem:[%s1061_s4 + $0x98] sm:$0xff] %vm660_vm2, %v647_v50  ;;  %v645_v54 = vsel %vm581_vm10, %v505_v44, %v613_v48  ;;  %662 = vst.msk [vmem:[%s1061_s4 + $0x8] sm:$0xff] %vm660_vm2, %v629_v53  ;;  %v454_v59 = vadd.f32 %v1051_v20, %v453_v57  ;;  %v518_v60 = vadd.f32 %v1051_v20, %v517_v58  ;;  %v861_v61 = vpop.f32.mrb[6].mxu0  ;;  %v877_v62 = vpop.f32.mrb[6].mxu1 }
  0xf2   : > { %678 = vst.msk [vmem:[%s1061_s4 + $0x88] sm:$0xff] %vm660_vm2, %v645_v54  ;;  %vm570_vm11 = vcmp.ge.f32.partialorder %v462_v55, 0.0  ;;  %v602_v63 = vmul.f32 0.2, %v462_v55  ;;  %vm586_vm12 = vcmp.ge.f32.partialorder %v526_v56, 0.0  ;;  %v465_v5 = vadd.f32 %v861_v61, %v1051_v20  ;;  %v456_v7 = vpop.f32.mrb[7].mxu0 }
  0xf3   : > { %v618_v0 = vmul.f32 0.2, %v526_v56  ;;  %vm568_vm13 = vcmp.ge.f32.partialorder %v454_v59, 0.0  ;;  %v600_v1 = vmul.f32 0.2, %v454_v59  ;;  %vm584_vm14 = vcmp.ge.f32.partialorder %v518_v60, 0.0 }
  0xf4   : > { %v616_v2 = vmul.f32 0.2, %v518_v60  ;;  %v634_v3 = vsel %vm570_vm11, %v462_v55, %v602_v63  ;;  %v529_v6 = vadd.f32 %v877_v62, %v1051_v20  ;;  %v520_v8 = vpop.f32.mrb[7].mxu1  ;;  %v457_v11 = vadd.f32 %v1051_v20, %v456_v7 }
  0xf5   : > { %v650_v4 = vsel %vm586_vm12, %v526_v56, %v618_v0  ;;  %667 = vst.msk [vmem:[%s1061_s4 + $0x30] sm:$0xff] %vm660_vm2, %v634_v3  ;;  %v632_v9 = vsel %vm568_vm13, %v454_v59, %v600_v1  ;;  %v521_v12 = vadd.f32 %v1051_v20, %v520_v8  ;;  %vm571_vm15 = vcmp.ge.f32.partialorder %v465_v5, 0.0 }
  0xf6   : > { %683 = vst.msk [vmem:[%s1061_s4 + $0xb0] sm:$0xff] %vm660_vm2, %v650_v4  ;;  %v648_v10 = vsel %vm584_vm14, %v518_v60, %v616_v2  ;;  %665 = vst.msk [vmem:[%s1061_s4 + $0x20] sm:$0xff] %vm660_vm2, %v632_v9  ;;  %v603_v13 = vmul.f32 0.2, %v465_v5  ;;  %vm587_vm0 = vcmp.ge.f32.partialorder %v529_v6, 0.0  ;;  %vm569_vm1 = vcmp.ge.f32.partialorder %v457_v11, 0.0 }
  0xf7   : > { %681 = vst.msk [vmem:[%s1061_s4 + $0xa0] sm:$0xff] %vm660_vm2, %v648_v10  ;;  %v619_v14 = vmul.f32 0.2, %v529_v6  ;;  %v601_v15 = vmul.f32 0.2, %v457_v11  ;;  %vm585_vm3 = vcmp.ge.f32.partialorder %v521_v12, 0.0 }
  0xf8   : > { %v617_v16 = vmul.f32 0.2, %v521_v12  ;;  %v635_v17 = vsel %vm571_vm15, %v465_v5, %v603_v13  ;;  %v864_v19 = vpop.f32.mrb[8].mxu0  ;;  %v880_v21 = vpop.f32.mrb[8].mxu1 }
  0xf9   : > { %v651_v18 = vsel %vm587_vm0, %v529_v6, %v619_v14  ;;  %668 = vst.msk [vmem:[%s1061_s4 + $0x38] sm:$0xff] %vm660_vm2, %v635_v17  ;;  %v633_v22 = vsel %vm569_vm1, %v457_v11, %v601_v15  ;;  %v478_v24 = vadd.f32 %v864_v19, %v1051_v20  ;;  %v542_v25 = vadd.f32 %v880_v21, %v1051_v20  ;;  %v469_v26 = vpop.f32.mrb[9].mxu0  ;;  %v533_v27 = vpop.f32.mrb[9].mxu1 }
  0xfa   : > { %684 = vst.msk [vmem:[%s1061_s4 + $0xb8] sm:$0xff] %vm660_vm2, %v651_v18  ;;  %v649_v23 = vsel %vm585_vm3, %v521_v12, %v617_v16  ;;  %666 = vst.msk [vmem:[%s1061_s4 + $0x28] sm:$0xff] %vm660_vm2, %v633_v22  ;;  %v470_v28 = vadd.f32 %v1051_v20, %v469_v26  ;;  %v534_v29 = vadd.f32 %v1051_v20, %v533_v27  ;;  %v865_v30 = vpop.f32.mrb[10].mxu0  ;;  %v881_v31 = vpop.f32.mrb[10].mxu1 }
  0xfb   : > { %682 = vst.msk [vmem:[%s1061_s4 + $0xa8] sm:$0xff] %vm660_vm2, %v649_v23  ;;  %vm574_vm4 = vcmp.ge.f32.partialorder %v478_v24, 0.0  ;;  %v606_v32 = vmul.f32 0.2, %v478_v24  ;;  %vm590_vm5 = vcmp.ge.f32.partialorder %v542_v25, 0.0  ;;  %v481_v38 = vadd.f32 %v865_v30, %v1051_v20  ;;  %v472_v40 = vpop.f32.mrb[11].mxu0 }
  0xfc   : > { %v622_v33 = vmul.f32 0.2, %v542_v25  ;;  %vm572_vm6 = vcmp.ge.f32.partialorder %v470_v28, 0.0  ;;  %v604_v34 = vmul.f32 0.2, %v470_v28  ;;  %vm588_vm7 = vcmp.ge.f32.partialorder %v534_v29, 0.0 }
  0xfd   : > { %v620_v35 = vmul.f32 0.2, %v534_v29  ;;  %v638_v36 = vsel %vm574_vm4, %v478_v24, %v606_v32  ;;  %v545_v39 = vadd.f32 %v881_v31, %v1051_v20  ;;  %v536_v41 = vpop.f32.mrb[11].mxu1  ;;  %v473_v44 = vadd.f32 %v1051_v20, %v472_v40 }
  0xfe   : > { %v654_v37 = vsel %vm590_vm5, %v542_v25, %v622_v33  ;;  %671 = vst.msk [vmem:[%s1061_s4 + $0x50] sm:$0xff] %vm660_vm2, %v638_v36  ;;  %v636_v42 = vsel %vm572_vm6, %v470_v28, %v604_v34  ;;  %v537_v45 = vadd.f32 %v1051_v20, %v536_v41  ;;  %v868_v46 = vpop.f32.mrb[12].mxu0  ;;  %vm575_vm8 = vcmp.ge.f32.partialorder %v481_v38, 0.0 }
  0xff   : > { %687 = vst.msk [vmem:[%s1061_s4 + $0xd0] sm:$0xff] %vm660_vm2, %v654_v37  ;;  %v652_v43 = vsel %vm588_vm7, %v534_v29, %v620_v35  ;;  %v884_v47 = vpop.f32.mrb[12].mxu1  ;;  %669 = vst.msk [vmem:[%s1061_s4 + $0x40] sm:$0xff] %vm660_vm2, %v636_v42  ;;  %v607_v48 = vmul.f32 0.2, %v481_v38  ;;  %vm591_vm9 = vcmp.ge.f32.partialorder %v545_v39, 0.0  ;;  %v494_v54 = vadd.f32 %v868_v46, %v1051_v20 }
 0x100   : > { %685 = vst.msk [vmem:[%s1061_s4 + $0xc0] sm:$0xff] %vm660_vm2, %v652_v43  ;;  %v623_v49 = vmul.f32 0.2, %v545_v39  ;;  %vm573_vm10 = vcmp.ge.f32.partialorder %v473_v44, 0.0  ;;  %v605_v50 = vmul.f32 0.2, %v473_v44  ;;  %v558_v55 = vadd.f32 %v884_v47, %v1051_v20 }
 0x101   : > { %vm589_vm11 = vcmp.ge.f32.partialorder %v537_v45, 0.0  ;;  %v621_v51 = vmul.f32 0.2, %v537_v45  ;;  %v639_v52 = vsel %vm575_vm8, %v481_v38, %v607_v48  ;;  %v485_v56 = vpop.f32.mrb[13].mxu0  ;;  %v549_v57 = vpop.f32.mrb[13].mxu1  ;;  %vm578_vm12 = vcmp.ge.f32.partialorder %v494_v54, 0.0 }
 0x102   : > { %v655_v53 = vsel %vm591_vm9, %v545_v39, %v623_v49  ;;  %672 = vst.msk [vmem:[%s1061_s4 + $0x58] sm:$0xff] %vm660_vm2, %v639_v52  ;;  %v637_v58 = vsel %vm573_vm10, %v473_v44, %v605_v50  ;;  %v486_v60 = vadd.f32 %v1051_v20, %v485_v56  ;;  %v550_v61 = vadd.f32 %v1051_v20, %v549_v57  ;;  %v869_v62 = vpop.f32.mrb[14].mxu0  ;;  %v885_v63 = vpop.f32.mrb[14].mxu1 }
 0x103   : > { %688 = vst.msk [vmem:[%s1061_s4 + $0xd8] sm:$0xff] %vm660_vm2, %v655_v53  ;;  %v653_v59 = vsel %vm589_vm11, %v537_v45, %v621_v51  ;;  %670 = vst.msk [vmem:[%s1061_s4 + $0x48] sm:$0xff] %vm660_vm2, %v637_v58  ;;  %v610_v0 = vmul.f32 0.2, %v494_v54  ;;  %vm594_vm13 = vcmp.ge.f32.partialorder %v558_v55, 0.0  ;;  %v497_v6 = vadd.f32 %v869_v62, %v1051_v20  ;;  %v488_v8 = vpop.f32.mrb[15].mxu0 }
 0x104   : > { %686 = vst.msk [vmem:[%s1061_s4 + $0xc8] sm:$0xff] %vm660_vm2, %v653_v59  ;;  %v626_v1 = vmul.f32 0.2, %v558_v55  ;;  %vm576_vm14 = vcmp.ge.f32.partialorder %v486_v60, 0.0  ;;  %v608_v2 = vmul.f32 0.2, %v486_v60  ;;  %v561_v7 = vadd.f32 %v885_v63, %v1051_v20 }
 0x105   : > { %vm592_vm15 = vcmp.ge.f32.partialorder %v550_v61, 0.0  ;;  %v624_v3 = vmul.f32 0.2, %v550_v61  ;;  %v642_v4 = vsel %vm578_vm12, %v494_v54, %v610_v0  ;;  %v552_v9 = vpop.f32.mrb[15].mxu1  ;;  %v489_v12 = vadd.f32 %v1051_v20, %v488_v8 }
 0x106   : > { %v658_v5 = vsel %vm594_vm13, %v558_v55, %v626_v1  ;;  %675 = vst.msk [vmem:[%s1061_s4 + $0x70] sm:$0xff] %vm660_vm2, %v642_v4  ;;  %v640_v10 = vsel %vm576_vm14, %v486_v60, %v608_v2  ;;  %v553_v13 = vadd.f32 %v1051_v20, %v552_v9  ;;  %vm579_vm0 = vcmp.ge.f32.partialorder %v497_v6, 0.0 }
 0x107   : > { %691 = vst.msk [vmem:[%s1061_s4 + $0xf0] sm:$0xff] %vm660_vm2, %v658_v5  ;;  %v656_v11 = vsel %vm592_vm15, %v550_v61, %v624_v3  ;;  %673 = vst.msk [vmem:[%s1061_s4 + $0x60] sm:$0xff] %vm660_vm2, %v640_v10  ;;  %v611_v14 = vmul.f32 0.2, %v497_v6  ;;  %vm595_vm1 = vcmp.ge.f32.partialorder %v561_v7, 0.0  ;;  %vm577_vm3 = vcmp.ge.f32.partialorder %v489_v12, 0.0 }
 0x108   : > { %689 = vst.msk [vmem:[%s1061_s4 + $0xe0] sm:$0xff] %vm660_vm2, %v656_v11  ;;  %v627_v15 = vmul.f32 0.2, %v561_v7  ;;  %v609_v16 = vmul.f32 0.2, %v489_v12  ;;  %vm593_vm4 = vcmp.ge.f32.partialorder %v553_v13, 0.0 }
 0x109   : > { %v625_v17 = vmul.f32 0.2, %v553_v13  ;;  %v643_v18 = vsel %vm579_vm0, %v497_v6, %v611_v14 }
 0x10a   : > { %v659_v19 = vsel %vm595_vm1, %v561_v7, %v627_v15  ;;  %676 = vst.msk [vmem:[%s1061_s4 + $0x78] sm:$0xff] %vm660_vm2, %v643_v18  ;;  %v641_v20 = vsel %vm577_vm3, %v489_v12, %v609_v16 }
 0x10b   : > { %692 = vst.msk [vmem:[%s1061_s4 + $0xf8] sm:$0xff] %vm660_vm2, %v659_v19  ;;  %v657_v21 = vsel %vm593_vm4, %v553_v13, %v625_v17  ;;  %674 = vst.msk [vmem:[%s1061_s4 + $0x68] sm:$0xff] %vm660_vm2, %v641_v20 }
 0x10c   : > { %690 = vst.msk [vmem:[%s1061_s4 + $0xe8] sm:$0xff] %vm660_vm2, %v657_v21 }
 0x10d PF: > { %s13_s14 = sadd.s32 1, %s959_s14   ;;  %s1168_s12 = smov %s955_s13 }
 0x10e   : > { %p10_p5 = scmp.ge.s32.totalorder %s13_s14, 4   ;;  %s1169_s13 = smov %s1171_s15 }
 0x110   :  { %12 = sbr.rel (!%p10_p5) target bundleno = 2 (0x2), region = 62 }

</bundles_post_ra>
